<compile_context>
chip_gen: v6e
topology: v6e:2x2x1
jax: 0.10.0
libtpu: 0.0.40
codegen_flags: <defaults>
</compile_context>

<pallas_src>
import functools

import jax
import jax.numpy as jnp
from jax.experimental import pallas as pl
from jax.experimental.pallas import tpu as pltpu


def _circle_loss_kernel(nw_ref, sp_ref, pw_ref, sn_ref, out_ref,
                        *, m, gamma, b_total, b_tile):
    # sp_ref/pw_ref: (Kp, Bt), sn_ref: (Kn, Bt)  -- B on the lane axis.
    sp = sp_ref[...].astype(jnp.float32)
    pw = pw_ref[...].astype(jnp.float32)
    sn = sn_ref[...].astype(jnp.float32)
    neg_w = nw_ref[0, 0]                                  # SMEM scalar

    # ----- positive branch: logsumexp over axis 0 (length Kp) -----
    ap = jnp.maximum(-sp + (1.0 + m), 0.0)                # clamp_min(-sp + 1 + m, 0)
    logit_p = -ap * (sp - (1.0 - m)) * gamma * pw         # (Kp, Bt)
    if sp.shape[0] == 1:
        lse_p = logit_p                                   # logsumexp over len-1 axis = identity
    else:
        mp = jnp.max(logit_p, axis=0, keepdims=True)      # (1, Bt)
        lse_p = mp + jnp.log(jnp.sum(jnp.exp(logit_p - mp), axis=0, keepdims=True))

    # ----- negative branch: logsumexp over axis 0 (length Kn) -----
    an = jnp.maximum(sn + m, 0.0)                         # clamp_min(sn + m, 0)
    logit_n = an * (sn - m) * gamma * neg_w               # (Kn, Bt)
    if sn.shape[0] == 1:
        lse_n = logit_n
    else:
        mn = jnp.max(logit_n, axis=0, keepdims=True)      # (1, Bt)
        lse_n = mn + jnp.log(jnp.sum(jnp.exp(logit_n - mn), axis=0, keepdims=True))

    # ----- stable softplus per column, masked partial sum for this tile -----
    z = lse_p + lse_n                                     # (1, Bt)
    spls = jnp.maximum(z, 0.0) + jnp.log1p(jnp.exp(-jnp.abs(z)))

    if b_total % b_tile != 0:                             # static: only if B was padded
        col = (pl.program_id(0) * b_tile
               + jax.lax.broadcasted_iota(jnp.int32, (1, b_tile), 1))
        spls = jnp.where(col < b_total, spls, 0.0)

    out_ref[0, 0] = jnp.sum(spls)


def _ensure_float(x):
    x = jnp.asarray(x)
    if not jnp.issubdtype(x.dtype, jnp.floating):
        x = x.astype(jnp.float32)
    return x


def circle_loss(sp, sn, pos_weights=None, *, m=0.15, gamma=1.0, block_b=None):
    """Pallas implementation of CircleLoss.forward (both sp and sn provided)."""
    if sp is None or sn is None:
        # TODO(synk): the sp-only / sn-only branches (one logsumexp term forced
        # to 0) are not routed through the Pallas kernel.
        raise NotImplementedError("circle_loss kernel requires both sp and sn")

    sp = _ensure_float(sp)
    sn = _ensure_float(sn)

    if sp.ndim == 1:                       # torch: sp = sp.unsqueeze(-1)
        sp = sp[:, None]
    B, Kp = sp.shape

    if sn.ndim == 1:
        # torch's `sn.unsqueeze(-1)` is a no-op (not assigned): a 1-D sn acts as
        # a single row of negatives shared by every sp row.  Broadcasting it to
        # (B, Kn) keeps the per-row logsumexp identical and lets the kernel
        # tile over B uniformly.
        sn = jnp.broadcast_to(sn[None, :], (B, sn.shape[0]))
    elif sn.shape[0] == 1 and B > 1:
        sn = jnp.broadcast_to(sn, (B, sn.shape[1]))
    Kn = sn.shape[1]

    if pos_weights is None:
        neg_w = jnp.ones((1, 1), jnp.float32)             # mean(ones) == 1
        pw = jnp.ones_like(sp)
    else:
        pos_weights = _ensure_float(pos_weights)
        # Global mean of the *original* pos_weights (matches torch pos_weights.mean()).
        neg_w = jnp.reshape(jnp.mean(pos_weights.astype(jnp.float32)), (1, 1))
        pw = jnp.broadcast_to(pos_weights, sp.shape)

    # ----- lane-tile selection: B on the 128-lane axis, padded to the tile -----
    if block_b is None:
        bytes_per_col = (2 * Kp + Kn) * 4                 # f32 upper bound per column
        # keep the double-buffered working set small enough for v7x's 32 MiB
        # scoped VMEM with plenty of headroom, but amortize per-step overhead.
        max_bt = max(128, ((8 * 1024 * 1024) // (2 * bytes_per_col)) // 128 * 128)
        block_b = min(max_bt, 2048)
    Bt = max(128, (int(block_b) + 127) // 128 * 128)
    if B <= Bt:
        Bt = max(128, -(-B // 128) * 128)                 # single tile, padded to 128
    padded_B = -(-B // Bt) * Bt
    num_tiles = padded_B // Bt
    pad = padded_B - B

    # Transpose so B sits on the lane axis, then zero-pad the remainder tile.
    spT = jnp.pad(sp.T, ((0, 0), (0, pad)))               # (Kp, padded_B)
    pwT = jnp.pad(pw.T, ((0, 0), (0, pad)))               # (Kp, padded_B)
    snT = jnp.pad(sn.T, ((0, 0), (0, pad)))               # (Kn, padded_B)

    kernel = functools.partial(
        _circle_loss_kernel, m=float(m), gamma=float(gamma),
        b_total=B, b_tile=Bt)

    in_bytes = (spT.size * spT.dtype.itemsize
                + pwT.size * pwT.dtype.itemsize
                + snT.size * snT.dtype.itemsize)
    cost = pl.CostEstimate(
        flops=int(10 * B * (Kp + Kn) + 8 * B),
        transcendentals=int(B * (Kp + Kn) + 4 * B),
        bytes_accessed=int(in_bytes + 4 + 4 * num_tiles),
    )

    partial_sums = pl.pallas_call(
        kernel,
        grid=(num_tiles,),
        in_specs=[
            pl.BlockSpec(memory_space=pltpu.SMEM),                 # neg_w (1,1) scalar
            pl.BlockSpec((Kp, Bt), lambda i: (0, i)),              # spT tile
            pl.BlockSpec((Kp, Bt), lambda i: (0, i)),              # pwT tile
            pl.BlockSpec((Kn, Bt), lambda i: (0, i)),              # snT tile
        ],
        out_specs=pl.BlockSpec((1, 1), lambda i: (0, i), memory_space=pltpu.SMEM),
        out_shape=jax.ShapeDtypeStruct((1, num_tiles), jnp.float32),
        compiler_params=pltpu.CompilerParams(
            dimension_semantics=("parallel",)),
        cost_estimate=cost,
    )(neg_w, spT, pwT, snT)

    # Tiny final reduction over per-tile partial sums (megacore-safe).
    return jnp.sum(partial_sums) / jnp.float32(B)


def _circle_loss_ref(sp, sn, pos_weights=None, *, m=0.15, gamma=1.0):
    """Pure-JAX reference matching the PyTorch module (both sp and sn given)."""
    sp = jnp.asarray(sp, jnp.float32)
    sn = jnp.asarray(sn, jnp.float32)
    if sp.ndim == 1:
        sp = sp[:, None]
    if sn.ndim == 1:
        sn = sn[None, :]                                   # torch unsqueeze was a no-op
    w = 1.0 if pos_weights is None else jnp.asarray(pos_weights, jnp.float32)
    ap = jnp.maximum(-sp + 1.0 + m, 0.0)
    logit_p = -ap * (sp - (1.0 - m)) * gamma * w
    lse_p = jax.scipy.special.logsumexp(logit_p, axis=-1)
    an = jnp.maximum(sn + m, 0.0)
    nw = 1.0 if pos_weights is None else jnp.mean(jnp.asarray(pos_weights, jnp.float32))
    logit_n = an * (sn - m) * gamma * nw
    lse_n = jax.scipy.special.logsumexp(logit_n, axis=-1)
    return jnp.mean(jax.nn.softplus(lse_p + lse_n))


if __name__ == "__main__":
    key = jax.random.PRNGKey(0)
    k1, k2, k3 = jax.random.split(key, 3)
    B, Kp, Kn = 8, 16, 32
    sp = jax.random.uniform(k1, (B, Kp), jnp.float32, minval=-1.0, maxval=1.0)
    sn = jax.random.uniform(k2, (B, Kn), jnp.float32, minval=-1.0, maxval=1.0)
    pos_weights = jax.random.uniform(k3, (B, Kp), jnp.float32, minval=0.5, maxval=1.5)

    # 1) f32 with pos_weights
    out = jax.block_until_ready(circle_loss(sp, sn, pos_weights, m=0.15, gamma=1.0))
    ref = _circle_loss_ref(sp, sn, pos_weights, m=0.15, gamma=1.0)
    assert jnp.allclose(out, ref, atol=1e-5, rtol=1e-5), (out, ref)

    # 2) pos_weights=None path
    out2 = jax.block_until_ready(circle_loss(sp, sn, None))
    ref2 = _circle_loss_ref(sp, sn, None)
    assert jnp.allclose(out2, ref2, atol=1e-5, rtol=1e-5), (out2, ref2)

    # 3) multi-tile path with a remainder tile (padding + masking exercised)
    kb1, kb2, kb3 = jax.random.split(jax.random.PRNGKey(1), 3)
    Bb = 200
    spb = jax.random.uniform(kb1, (Bb, Kp), jnp.float32, minval=-1.0, maxval=1.0)
    snb = jax.random.uniform(kb2, (Bb, Kn), jnp.float32, minval=-1.0, maxval=1.0)
    pwb = jax.random.uniform(kb3, (Bb, Kp), jnp.float32, minval=0.5, maxval=1.5)
    out3 = jax.block_until_ready(circle_loss(spb, snb, pwb, block_b=128))
    ref3 = _circle_loss_ref(spb, snb, pwb)
    assert jnp.allclose(out3, ref3, atol=1e-5, rtol=1e-5), (out3, ref3)

    # 4) bf16 inputs from HBM, f32 math inside the kernel
    out4 = jax.block_until_ready(
        circle_loss(sp.astype(jnp.bfloat16), sn.astype(jnp.bfloat16),
                    pos_weights.astype(jnp.bfloat16)))
    ref4 = _circle_loss_ref(sp.astype(jnp.bfloat16), sn.astype(jnp.bfloat16),
                            pos_weights.astype(jnp.bfloat16))
    assert jnp.allclose(out4, ref4, atol=1e-4, rtol=1e-4), (out4, ref4)

    # 5) 1-D sp (Kp==1 logsumexp shortcut) and 1-D sn (shared negatives row)
    sp1 = jax.random.uniform(jax.random.PRNGKey(2), (B,), jnp.float32, minval=-1.0, maxval=1.0)
    sn1 = jax.random.uniform(jax.random.PRNGKey(3), (Kn,), jnp.float32, minval=-1.0, maxval=1.0)
    out5 = jax.block_until_ready(circle_loss(sp1, sn1, None))
    ref5 = _circle_loss_ref(sp1, sn1, None)
    assert jnp.allclose(out5, ref5, atol=1e-5, rtol=1e-5), (out5, ref5)

    print("KERNEL_OK")
</pallas_src>

<mosaic_0001>
module attributes {stable_mosaic.version = 11 : i64} {
  func.func @_circle_loss_kernel(%arg0: i32, %arg1: memref<1x1xf32, #tpu.memory_space<smem>>, %arg2: memref<16x128xf32, #tpu.memory_space<vmem>>, %arg3: memref<16x128xf32, #tpu.memory_space<vmem>>, %arg4: memref<32x128xf32, #tpu.memory_space<vmem>>, %arg5: memref<1x1xf32, #tpu.memory_space<smem>>) attributes {dimension_semantics = [#tpu.dimension_semantics<parallel>], iteration_bounds = array<i64: 1>, scalar_prefetch = 0 : i64, scratch_operands = 0 : i64, tpu.core_type = #tpu.core_type<tc>, window_params = [{transform_indices = @transform_0, window_bounds = array<i64: 1, 1>}, {transform_indices = @transform_1, window_bounds = array<i64: 16, 128>}, {transform_indices = @transform_2, window_bounds = array<i64: 16, 128>}, {transform_indices = @transform_3, window_bounds = array<i64: 32, 128>}, {transform_indices = @transform_4, window_bounds = array<i64: 1, 1>}]} {
    %c0 = arith.constant 0 : index
    %c0_0 = arith.constant 0 : index
    %0 = vector.load %arg2[%c0, %c0_0] : memref<16x128xf32, #tpu.memory_space<vmem>>, vector<16x128xf32>
    %c0_1 = arith.constant 0 : index
    %c0_2 = arith.constant 0 : index
    %1 = vector.load %arg3[%c0_1, %c0_2] : memref<16x128xf32, #tpu.memory_space<vmem>>, vector<16x128xf32>
    %c0_3 = arith.constant 0 : index
    %c0_4 = arith.constant 0 : index
    %2 = vector.load %arg4[%c0_3, %c0_4] : memref<32x128xf32, #tpu.memory_space<vmem>>, vector<32x128xf32>
    %c0_5 = arith.constant 0 : index
    %c0_6 = arith.constant 0 : index
    %3 = memref.load %arg1[%c0_5, %c0_6] : memref<1x1xf32, #tpu.memory_space<smem>>
    %cst = arith.constant 0.000000e+00 : f32
    %4 = vector.broadcast %cst : f32 to vector<16x128xf32>
    %5 = arith.subf %4, %0 : vector<16x128xf32>
    %cst_7 = arith.constant 1.150000e+00 : f32
    %6 = vector.broadcast %cst_7 : f32 to vector<16x128xf32>
    %7 = arith.addf %5, %6 : vector<16x128xf32>
    %cst_8 = arith.constant 0.000000e+00 : f32
    %8 = vector.broadcast %cst_8 : f32 to vector<16x128xf32>
    %9 = arith.maximumf %7, %8 : vector<16x128xf32>
    %cst_9 = arith.constant 0.000000e+00 : f32
    %10 = vector.broadcast %cst_9 : f32 to vector<16x128xf32>
    %11 = arith.subf %10, %9 : vector<16x128xf32>
    %cst_10 = arith.constant 8.500000e-01 : f32
    %12 = vector.broadcast %cst_10 : f32 to vector<16x128xf32>
    %13 = arith.subf %0, %12 : vector<16x128xf32>
    %14 = arith.mulf %11, %13 : vector<16x128xf32>
    %cst_11 = arith.constant 1.000000e+00 : f32
    %15 = vector.broadcast %cst_11 : f32 to vector<16x128xf32>
    %16 = arith.mulf %14, %15 : vector<16x128xf32>
    %17 = arith.mulf %16, %1 : vector<16x128xf32>
    %cst_12 = arith.constant dense<0xFF800000> : vector<128xf32>
    %18 = vector.multi_reduction <maximumf>, %17, %cst_12 [0] : vector<16x128xf32> to vector<128xf32>
    %19 = vector.shape_cast %18 : vector<128xf32> to vector<1x128xf32>
    %20 = vector.broadcast %19 : vector<1x128xf32> to vector<16x128xf32>
    %21 = arith.subf %17, %20 : vector<16x128xf32>
    %22 = math.exp %21 : vector<16x128xf32>
    %cst_13 = arith.constant dense<0.000000e+00> : vector<128xf32>
    %23 = vector.multi_reduction <add>, %22, %cst_13 [0] : vector<16x128xf32> to vector<128xf32>
    %24 = vector.shape_cast %23 : vector<128xf32> to vector<1x128xf32>
    %25 = math.log %24 : vector<1x128xf32>
    %26 = arith.addf %19, %25 : vector<1x128xf32>
    %cst_14 = arith.constant 1.500000e-01 : f32
    %27 = vector.broadcast %cst_14 : f32 to vector<32x128xf32>
    %28 = arith.addf %2, %27 : vector<32x128xf32>
    %cst_15 = arith.constant 0.000000e+00 : f32
    %29 = vector.broadcast %cst_15 : f32 to vector<32x128xf32>
    %30 = arith.maximumf %28, %29 : vector<32x128xf32>
    %cst_16 = arith.constant 1.500000e-01 : f32
    %31 = vector.broadcast %cst_16 : f32 to vector<32x128xf32>
    %32 = arith.subf %2, %31 : vector<32x128xf32>
    %33 = arith.mulf %30, %32 : vector<32x128xf32>
    %cst_17 = arith.constant 1.000000e+00 : f32
    %34 = vector.broadcast %cst_17 : f32 to vector<32x128xf32>
    %35 = arith.mulf %33, %34 : vector<32x128xf32>
    %36 = vector.broadcast %3 : f32 to vector<32x128xf32>
    %37 = arith.mulf %35, %36 : vector<32x128xf32>
    %cst_18 = arith.constant dense<0xFF800000> : vector<128xf32>
    %38 = vector.multi_reduction <maximumf>, %37, %cst_18 [0] : vector<32x128xf32> to vector<128xf32>
    %39 = vector.shape_cast %38 : vector<128xf32> to vector<1x128xf32>
    %40 = vector.broadcast %39 : vector<1x128xf32> to vector<32x128xf32>
    %41 = arith.subf %37, %40 : vector<32x128xf32>
    %42 = math.exp %41 : vector<32x128xf32>
    %cst_19 = arith.constant dense<0.000000e+00> : vector<128xf32>
    %43 = vector.multi_reduction <add>, %42, %cst_19 [0] : vector<32x128xf32> to vector<128xf32>
    %44 = vector.shape_cast %43 : vector<128xf32> to vector<1x128xf32>
    %45 = math.log %44 : vector<1x128xf32>
    %46 = arith.addf %39, %45 : vector<1x128xf32>
    %47 = arith.addf %26, %46 : vector<1x128xf32>
    %cst_20 = arith.constant 0.000000e+00 : f32
    %48 = vector.broadcast %cst_20 : f32 to vector<1x128xf32>
    %49 = arith.maximumf %47, %48 : vector<1x128xf32>
    %50 = math.absf %47 : vector<1x128xf32>
    %cst_21 = arith.constant 0.000000e+00 : f32
    %51 = vector.broadcast %cst_21 : f32 to vector<1x128xf32>
    %52 = arith.subf %51, %50 : vector<1x128xf32>
    %53 = math.exp %52 : vector<1x128xf32>
    %54 = math.log1p %53 : vector<1x128xf32>
    %55 = arith.addf %49, %54 : vector<1x128xf32>
    %c128_i32 = arith.constant 128 : i32
    %56 = arith.muli %arg0, %c128_i32 : i32
    %57 = tpu.iota {dimensions = array<i32: 1>} : vector<1x128xi32>
    %58 = vector.broadcast %56 : i32 to vector<1x128xi32>
    %59 = arith.addi %58, %57 : vector<1x128xi32>
    %c8_i32 = arith.constant 8 : i32
    %60 = vector.broadcast %c8_i32 : i32 to vector<1x128xi32>
    %61 = arith.cmpi slt, %59, %60 : vector<1x128xi32>
    %cst_22 = arith.constant 0.000000e+00 : f32
    %62 = vector.broadcast %cst_22 : f32 to vector<1x128xf32>
    %63 = arith.select %61, %55, %62 : vector<1x128xi1>, vector<1x128xf32>
    %64 = vector.shape_cast %63 : vector<1x128xf32> to vector<1x1x128xf32>
    %cst_23 = arith.constant dense<0.000000e+00> : vector<1xf32>
    %65 = vector.multi_reduction <add>, %64, %cst_23 [1, 2] : vector<1x1x128xf32> to vector<1xf32>
    %66 = vector.shape_cast %65 : vector<1xf32> to vector<1x1x1xf32>
    %67 = vector.extract %66[0, 0, 0] : f32 from vector<1x1x1xf32>
    %c0_24 = arith.constant 0 : index
    %c0_25 = arith.constant 0 : index
    %68 = memref.load %arg5[%c0_24, %c0_25] : memref<1x1xf32, #tpu.memory_space<smem>>
    memref.store %67, %arg5[%c0_24, %c0_25] : memref<1x1xf32, #tpu.memory_space<smem>>
    return
  }
  func.func @transform_0(%arg0: i32) -> (i32, i32) {
    %c0_i32 = arith.constant 0 : i32
    %c0_i32_0 = arith.constant 0 : i32
    %c0_i32_1 = arith.constant 0 : i32
    return %c0_i32, %c0_i32_0 : i32, i32
  }
  func.func @transform_1(%arg0: i32) -> (i32, i32) {
    %c0_i32 = arith.constant 0 : i32
    %c0_i32_0 = arith.constant 0 : i32
    return %c0_i32, %arg0 : i32, i32
  }
  func.func @transform_2(%arg0: i32) -> (i32, i32) {
    %c0_i32 = arith.constant 0 : i32
    %c0_i32_0 = arith.constant 0 : i32
    return %c0_i32, %arg0 : i32, i32
  }
  func.func @transform_3(%arg0: i32) -> (i32, i32) {
    %c0_i32 = arith.constant 0 : i32
    %c0_i32_0 = arith.constant 0 : i32
    return %c0_i32, %arg0 : i32, i32
  }
  func.func @transform_4(%arg0: i32) -> (i32, i32) {
    %c0_i32 = arith.constant 0 : i32
    %c0_i32_0 = arith.constant 0 : i32
    return %c0_i32, %arg0 : i32, i32
  }
}

</mosaic_0001>

<bundles_post_ra>
// kernel: tpu_custom_call.1
= control target key start
LH: loop header
LB: loop body
LE: loop exit
PB: predicated region body
PF: predicated region fallthrough
CT: control target
= control target key end

     0   :  { %10 = vsyncpa [#allocation4], 0  ;;  %s365_s0 = inlined_call_operand.<no memory space> [shape: f32[1,1], index: 0, kind: input, shape index: {}]   ;;  %s366_s1 = inlined_call_operand.hbm [shape: f32[16,128], index: 1, kind: input, shape index: {}]   ;;  %s367_s2 = inlined_call_operand.hbm [shape: f32[16,128], index: 2, kind: input, shape index: {}]   ;;  %s368_s3 = inlined_call_operand.hbm [shape: f32[32,128], index: 3, kind: input, shape index: {}]   ;;  %s369_s4 = inlined_call_operand.hbm [shape: f32[1,1], index: 4, kind: output, shape index: {}]  }
   0x1   :  { %11 = vsyncpa [#allocation7], 0 }
   0x2   :  { %12 = vsyncpa [#allocation5], 0  ;;  %s319_s15 = smov [#allocation6]   ;;  %s320_s17 = smov [#allocation3]  }
   0x3   :  { %s32_s16 = sshll.u32 %s319_s15, 4  ;;  %s20_s18 = sshll.u32 %s320_s17, 4  ;;  %s33_s16 = int_to_ptr.vmem [resolvable:$true] %s32_s16  ;;  %s21_s18 = int_to_ptr.vmem [resolvable:$true] %s20_s18 }
   0x4   :  { %s253_s19 = scalar_lea.vmem %s33_s16, 256  ;;  %p258_p1 = scmp.lt.s32.totalorder %s33_s16, %s33_s16 }
   0x5   :  { %p254_p0 = scmp.ne.s32.totalorder %s33_s16, %s253_s19  ;;  %p259_p2 = scmp.lt.s32.totalorder %s253_s19, %s253_s19 }
   0x7   :  { %p260_p3 = por %p259_p2, %p258_p1 }
   0x9   :  { %p261_p4 = pnand %p260_p3, %p254_p0 }
   0xb   :  { %264 = shalt.err (!%p261_p4)
}
   0xc   :  { %s321_s20 = smov 128   ;;  %s322_s21 = smov 8  }
   0xd   :  { %38 = dma.hbm_to_vmem [thread:$0]  %s367_s2, 256, %s33_s16, [#allocation7], %s321_s20, %s321_s20, %s322_s21  }
   0xe   :  { %s273_s24 = scalar_lea.vmem %s21_s18, 256  ;;  %p278_p6 = scmp.lt.s32.totalorder %s21_s18, %s21_s18 }
   0xf   :  { %p274_p5 = scmp.ne.s32.totalorder %s21_s18, %s273_s24  ;;  %p279_p7 = scmp.lt.s32.totalorder %s273_s24, %s273_s24 }
  0x11   :  { %p280_p8 = por %p279_p7, %p278_p6 }
  0x13   :  { %p281_p9 = pnand %p280_p8, %p274_p5 }
  0x15   :  { %284 = shalt.err (!%p281_p9)
}
  0x16   :  { %26 = dma.hbm_to_vmem [thread:$0]  %s366_s1, 256, %s21_s18, [#allocation4], %s321_s20, %s321_s20, %s322_s21  }
  0x17   :  { %s323_s27 = smov [#allocation8]  }
  0x18   :  { %s44_s28 = sshll.u32 %s323_s27, 4  ;;  %s45_s28 = int_to_ptr.vmem [resolvable:$true] %s44_s28 }
  0x19   :  { %s293_s29 = scalar_lea.vmem %s45_s28, 512  ;;  %p298_p11 = scmp.lt.s32.totalorder %s45_s28, %s45_s28 }
  0x1a   :  { %p294_p10 = scmp.ne.s32.totalorder %s45_s28, %s293_s29  ;;  %p299_p12 = scmp.lt.s32.totalorder %s293_s29, %s293_s29 }
  0x1c   :  { %p300_p13 = por %p299_p12, %p298_p11 }
  0x1e   :  { %p301_p0 = pnand %p300_p13, %p294_p10 }
  0x20   :  { %304 = shalt.err (!%p301_p0)
}
  0x21   :  { %50 = dma.hbm_to_vmem [thread:$0]  %s368_s3, 512, %s45_s28, [#allocation7], %s321_s20, %s321_s20, %s322_s21  }
  0x22   :  { %313 = dma.done.wait [#allocation4], 256  }
  0x23   :  { %314 = vsyncadd [#allocation4], 4294967040 }
  0x24   :  { %315 = dma.done.wait [#allocation7], 768  }
  0x25   :  { %316 = vsyncadd [#allocation7], 4294966528  ;;  %v60_v0 = vld [vmem:[#allocation3] sm:$0xff]  ;;  %v61_v1 = vld [vmem:[#allocation3 + $0x8] sm:$0xff]  ;;  %v122_v16 = vstv %s365_s0  ;;  %vm183_vm2 = vcmask 1040384   ;;  %s324_s5 = smov [#allocation9]  }
  0x26   :  { %v64_v2 = vld [vmem:[#allocation8] sm:$0xff]  ;;  %v65_v3 = vld [vmem:[#allocation8 + $0x8] sm:$0xff]  ;;  %v69_v4 = vsub.f32 0.0, %v60_v0  ;;  %v70_v5 = vsub.f32 0.0, %v61_v1  ;;  %v66_v6 = vld [vmem:[#allocation8 + $0x10] sm:$0xff] }
  0x27   :  { %v67_v7 = vld [vmem:[#allocation8 + $0x18] sm:$0xff]  ;;  %v211_v8 = vadd.f32 -0.85, %v60_v0  ;;  %v212_v9 = vadd.f32 -0.85, %v61_v1  ;;  %v62_v29 = vld [vmem:[#allocation6] sm:$0xff] }
  0x28   :  { %v71_v10 = vadd.f32 1.15, %v69_v4  ;;  %v72_v11 = vadd.f32 1.15, %v70_v5  ;;  %v106_v12 = vadd.f32 0.15, %v64_v2 }
  0x29   :  { %v107_v13 = vadd.f32 0.15, %v65_v3  ;;  %v108_v14 = vadd.f32 0.15, %v66_v6  ;;  %v109_v15 = vadd.f32 0.15, %v67_v7 }
  0x2a   :  { %v73_v17 = vmax.f32 %v71_v10, 0.0  ;;  %v74_v18 = vmax.f32 %v72_v11, 0.0  ;;  %v110_v19 = vmax.f32 %v106_v12, 0.0  ;;  %v213_v20 = vadd.f32 -0.15, %v64_v2  ;;  %v63_v30 = vld [vmem:[#allocation6 + $0x8] sm:$0xff] }
  0x2b   :  { %v111_v21 = vmax.f32 %v107_v13, 0.0  ;;  %v112_v22 = vmax.f32 %v108_v14, 0.0  ;;  %v113_v23 = vmax.f32 %v109_v15, 0.0  ;;  %v214_v24 = vadd.f32 -0.15, %v65_v3 }
  0x2c   :  { %v75_v25 = vsub.f32 0.0, %v73_v17  ;;  %v76_v26 = vsub.f32 0.0, %v74_v18  ;;  %v215_v27 = vadd.f32 -0.15, %v66_v6  ;;  %v216_v28 = vadd.f32 -0.15, %v67_v7 }
  0x2d   :  { %v118_v31 = vmul.f32 %v213_v20, %v110_v19  ;;  %v119_v32 = vmul.f32 %v214_v24, %v111_v21 }
  0x2e   :  { %v79_v33 = vmul.f32 %v211_v8, %v75_v25  ;;  %v80_v34 = vmul.f32 %v212_v9, %v76_v26  ;;  %v120_v35 = vmul.f32 %v215_v27, %v112_v22  ;;  %v121_v36 = vmul.f32 %v216_v28, %v113_v23 }
  0x2f   :  { %v123_v37 = vmul.f32 %v122_v16, %v118_v31  ;;  %v124_v38 = vmul.f32 %v122_v16, %v119_v32 }
  0x30   :  { %v81_v39 = vmul.f32 %v79_v33, %v62_v29  ;;  %v82_v40 = vmul.f32 %v80_v34, %v63_v30  ;;  %v125_v41 = vmul.f32 %v122_v16, %v120_v35  ;;  %v126_v42 = vmul.f32 %v122_v16, %v121_v36 }
  0x31   :  { %v127_v43 = vmax.f32 %v123_v37, %v124_v38 }
  0x32   :  { %v83_v44 = vmax.f32 %v81_v39, %v82_v40  ;;  %v128_v45 = vmax.f32 %v125_v41, %v126_v42 }
  0x34   :  { %v84_v46 = vrot.slane %v83_v44, 4  ;;  %v129_v47 = vmax.f32 %v127_v43, %v128_v45  ;;  %v177_v43 = vlaneseq }
  0x36   :  { %v85_v48 = vmax.f32 %v83_v44, %v84_v46  ;;  %v130_v49 = vrot.slane %v129_v47, 4  ;;  %v178_v46 = vand.u32 127, %v177_v43 }
  0x38   :  { %v86_v50 = vrot.slane %v85_v48, 2  ;;  %v131_v51 = vmax.f32 %v129_v47, %v130_v49  ;;  %vm181_vm1 = vcmp.lt.s32.totalorder %v178_v46, 8 }
  0x3a   :  { %v87_v52 = vmax.f32 %v85_v48, %v86_v50  ;;  %v132_v53 = vrot.slane %v131_v51, 2 }
  0x3c   :  { %v88_v54 = vrot.slane %v87_v52, 1  ;;  %v133_v55 = vmax.f32 %v131_v51, %v132_v53 }
  0x3e   :  { %v89_v56 = vmax.f32 %v87_v52, %v88_v54  ;;  %v134_v57 = vrot.slane %v133_v55, 1 }
  0x40   :  { %v90_v58 = vsub.f32 %v81_v39, %v89_v56  ;;  %v91_v59 = vsub.f32 %v82_v40, %v89_v56  ;;  %v135_v60 = vmax.f32 %v133_v55, %v134_v57 }
  0x42   :  { %v92_v61 = vmul.f32 1.442695, %v90_v58  ;;  %v94_v62 = vmul.f32 1.442695, %v91_v59  ;;  %v136_v63 = vsub.f32 %v123_v37, %v135_v60  ;;  %v137_v0 = vsub.f32 %v124_v38, %v135_v60 }
  0x43   :  { %v138_v1 = vsub.f32 %v125_v41, %v135_v60  ;;  %v139_v2 = vsub.f32 %v126_v42, %v135_v60 }
  0x44   :  { %225 = vpow2.f32 %v92_v61  ;;  %v140_v3 = vmul.f32 1.442695, %v136_v63  ;;  %v142_v4 = vmul.f32 1.442695, %v137_v0 }
  0x45   :  { %227 = vpow2.f32 %v94_v62  ;;  %v144_v5 = vmul.f32 1.442695, %v138_v1  ;;  %v146_v6 = vmul.f32 1.442695, %v139_v2 }
  0x46   :  { %229 = vpow2.f32 %v140_v3 }
  0x47   :  { %231 = vpow2.f32 %v142_v4 }
  0x48   :  { %233 = vpow2.f32 %v144_v5 }
  0x49   :  { %235 = vpow2.f32 %v146_v6 }
  0x51   :  { %v226_v7 = vpop.eup %225 }
  0x52   :  { %v228_v8 = vpop.eup %227 }
  0x53   :  { %v230_v9 = vpop.eup %229  ;;  %v96_v10 = vadd.f32 %v228_v8, %v226_v7 }
  0x54   :  { %v232_v11 = vpop.eup %231 }
  0x55   :  { %v234_v12 = vpop.eup %233  ;;  %v97_v13 = vrot.slane %v96_v10, 4  ;;  %v148_v14 = vadd.f32 %v232_v11, %v230_v9 }
  0x56   :  { %v236_v15 = vpop.eup %235 }
  0x57   :  { %v98_v16 = vadd.f32 %v97_v13, %v96_v10  ;;  %v149_v17 = vadd.f32 %v234_v12, %v148_v14 }
  0x59   :  { %v99_v18 = vrot.slane %v98_v16, 2  ;;  %v150_v19 = vadd.f32 %v236_v15, %v149_v17 }
  0x5b   :  { %v100_v20 = vadd.f32 %v99_v18, %v98_v16  ;;  %v151_v21 = vrot.slane %v150_v19, 4 }
  0x5d   :  { %v101_v22 = vrot.slane %v100_v20, 1  ;;  %v152_v23 = vadd.f32 %v151_v21, %v150_v19 }
  0x5f   :  { %v102_v24 = vadd.f32 %v101_v22, %v100_v20  ;;  %v153_v25 = vrot.slane %v152_v23, 2 }
  0x61   :  { %237 = vlog2.f32 %v102_v24  ;;  %v154_v26 = vadd.f32 %v153_v25, %v152_v23 }
  0x63   :  { %v155_v27 = vrot.slane %v154_v26, 1 }
  0x65   :  { %v156_v28 = vadd.f32 %v155_v27, %v154_v26 }
  0x67   :  { %239 = vlog2.f32 %v156_v28 }
  0x6e   :  { %v238_v29 = vpop.eup %237 }
  0x6f   :  { %v104_v30 = vmul.f32 0.6931472, %v238_v29 }
  0x71   :  { %v105_v32 = vadd.f32 %v104_v30, %v89_v56 }
  0x74   :  { %v240_v31 = vpop.eup %239 }
  0x75   :  { %v158_v33 = vmul.f32 0.6931472, %v240_v31 }
  0x77   :  { %v159_v34 = vadd.f32 %v158_v33, %v135_v60 }
  0x79   :  { %v160_v35 = vadd.f32 %v159_v34, %v105_v32 }
  0x7b   :  { %v162_v36 = vand.u32 2147483647, %v160_v35  ;;  %v161_v48 = vmax.f32 %v160_v35, 0.0 }
  0x7d   :  { %v163_v37 = vsub.f32 0.0, %v162_v36 }
  0x7f   :  { %v164_v38 = vmul.f32 1.442695, %v163_v37 }
  0x81   :  { %241 = vpow2.f32 %v164_v38 }
  0x8e   :  { %v242_v39 = vpop.eup %241 }
  0x8f   :  { %v166_v40 = vadd.f32 1.0, %v242_v39  ;;  %v169_v41 = vmul.f32 -0.5, %v242_v39  ;;  %v172_v44 = vand.u32 2147483647, %v242_v39 }
  0x91   :  { %243 = vlog2.f32 %v166_v40  ;;  %v170_v42 = vadd.f32 1.0, %v169_v41  ;;  %vm173_vm0 = vcmp.lt.f32.partialorder %v172_v44, 0.0004427343 }
  0x93   :  { %v171_v45 = vmul.f32 %v242_v39, %v170_v42 }
  0x9e   :  { %v244_v47 = vpop.eup %243 }
  0x9f   :  { %v168_v49 = vmul.f32 0.6931472, %v244_v47 }
  0xa1   :  { %v174_v50 = vsel %vm173_vm0, %v171_v45, %v168_v49 }
  0xa2   :  { %v175_v51 = vadd.f32 %v174_v50, %v161_v48 }
  0xa4   :  { %v182_v52 = vsel %vm181_vm1, %v175_v51, 0.0 }
  0xa5   :  { %v184_v53 = vsel %vm183_vm2, %v182_v52, 0.0 }
  0xa6   :  { %185 = vadd.xlane.f32.xlu0 %v184_v53 }
 0x12f   :  { %v186_v54 = vpop.xlane.xlu0 %185 }
 0x130   :  { %v187_v55 = vrot.slane %v186_v54, 4 }
 0x132   :  { %v188_v56 = vadd.f32 %v187_v55, %v186_v54 }
 0x134   :  { %v189_v57 = vrot.slane %v188_v56, 2 }
 0x136   :  { %v190_v58 = vadd.f32 %v189_v57, %v188_v56 }
 0x138   :  { %v191_v59 = vrot.slane %v190_v58, 1 }
 0x13a   :  { %v192_v60 = vadd.f32 %v191_v59, %v190_v58 }
 0x13c   :  { %217 = vpush %v192_v60 }
 0x16d   :  { %s218_s0 = spop %217 }
 0x16e   :  { %195 = sst [smem:[#allocation9]] %s218_s0 }
 0x16f   :  { %203 = dma.smem_to_hbm %s324_s5, 16, %s369_s4, [#allocation5]  }
 0x170   :  { %317 = dma.done.wait [#allocation5], 16  }
 0x171   :  { %318 = vsyncadd [#allocation5], 4294967280 }
 0x172   :  { %207 = sfence }
 0x173   :  { %208 = vsyncpa [#allocation4], 1 }
 0x174   :  { %209 = vsyncpa [#allocation7], 1 }
 0x175   :  { %210 = vsyncpa [#allocation5], 1 }

</bundles_post_ra>
